<compile_context>
chip_gen: v6e
topology: v6e:2x2x1
jax: 0.10.0
libtpu: 0.0.40
codegen_flags: <defaults>
</compile_context>

<pallas_src>
import jax
import jax.numpy as jnp
from jax.experimental import pallas as pl
from jax.experimental.pallas import tpu as pltpu

ALPHA = 0.5
IMPROVED = False
SELF_COEF = ALPHA * (ALPHA + 1.0)   # coefficient of the identity (self) term


# --------------------------------------------------------------------------- #
# Kernel
# --------------------------------------------------------------------------- #
def cons_graphconv_kernel(adj_ref, h_ref, b_ref, o_ref):
    # adj_ref : (BB, N, N)  bf16  = alpha * D^-1/2 (A + loops) D^-1/2   (pre-folded)
    # h_ref   : (BB, N, C)  bf16  = x @ W
    # b_ref   : (1,  N*C)   f32   = bias tiled N times (lane-dense, resident)
    # o_ref   : (BB, N*C)   f32   = lane-dense output slab
    adj = adj_ref[...]
    h = h_ref[...]
    BB, N, C = h.shape

    # Batched MXU matmul with f32 accumulation (bf16 operands).
    agg = jnp.einsum("bij,bjc->bic", adj, h,
                     preferred_element_type=jnp.float32)          # (BB, N, C) f32

    out = SELF_COEF * h.astype(jnp.float32) + agg                 # (BB, N, C) f32

    # Single lane-dense store: fold (N, C) into the lane dim, add resident bias.
    o_ref[...] = (out.reshape(BB, N * C) + b_ref[...]).astype(o_ref.dtype)


# --------------------------------------------------------------------------- #
# Tiling / VMEM sizing helpers
# --------------------------------------------------------------------------- #
def _round_up(x, m):
    return ((x + m - 1) // m) * m


def _per_graph_vmem_bytes(N, C):
    """Padded VMEM footprint per graph: double-buffered blocks + kernel temps."""
    NC = N * C
    adj = _round_up(N, 16) * _round_up(N, 128) * 2       # bf16 block, (16,128) tiles
    h = _round_up(N, 16) * _round_up(C, 128) * 2         # bf16 block
    out = _round_up(NC, 128) * 4                          # f32 slab row
    temps = 3 * _round_up(N, 8) * _round_up(C, 128) * 4 + 2 * _round_up(NC, 128) * 4
    return 2 * (adj + h + out) + temps                     # x2: pipeline double-buffer


def _vmem_budget_bytes():
    # ~1/4 of physical VMEM for the pipelined working set:
    # 32 MiB on v5e/v6e (128 MiB physical), 16 MiB on v7x (64 MiB) / unknown.
    try:
        cap = pltpu.get_tpu_info().vmem_capacity_bytes
    except Exception:
        cap = None
    return 32 * 2**20 if (cap is not None and cap >= 100 * 2**20) else 16 * 2**20


def _pick_batch_tile(B, N, C, budget):
    cap = max(1, budget // _per_graph_vmem_bytes(N, C))
    if B >= 16:
        # Keep >= 2 grid steps so v7x's two TensorCores both get work, while
        # keeping BB a multiple of 8 so (BB, N*C) output blocks stay dense.
        cap = min(cap, max(8, pl.cdiv(B, 2)))
    if cap >= B:
        return B                      # single full-batch block
    if cap >= 8:
        return (cap // 8) * 8         # sublane-aligned batch tile
    return cap                        # huge-N fallback; see row-tiling TODO


def _vmem_limit_bytes(BB, N, C):
    est = BB * _per_graph_vmem_bytes(N, C) + 8 * _round_up(N * C, 128) * 4 + (2 << 20)
    return int(min(48 * 2**20, max(est, 16 * 2**20)))


# --------------------------------------------------------------------------- #
# Wrapper
# --------------------------------------------------------------------------- #
def cons_graphconv(x, adj, weight, bias, *, add_loop=True, improved=IMPROVED):
    """x: (B,N,F) f32, adj: (B,N,N) f32 (batch-broadcastable), weight: (F,C), bias: (C,)."""
    if x.ndim == 2:
        x = x[None]
    if adj.ndim == 2:
        adj = adj[None]
    B, N, F_in = x.shape
    C = weight.shape[1]
    adj = jnp.broadcast_to(adj.astype(jnp.float32), (B, N, N))

    # --- one fused pass over adj: self-loops, f32 degree normalization, alpha
    # scale, bf16 downcast.  Degrees come from the exact f32 adjacency.
    if add_loop:
        loop_val = jnp.asarray(2.0 if improved else 1.0, dtype=jnp.float32)
        eye = jnp.eye(N, dtype=bool)[None]
        adj = jnp.where(eye, loop_val, adj)
    s = jax.lax.rsqrt(jnp.maximum(jnp.sum(adj, axis=-1), 1.0))          # (B, N)
    adj_scaled = (ALPHA * (s[:, :, None] * adj * s[:, None, :])).astype(jnp.bfloat16)

    # --- h = x @ W as one fused XLA matmul (tiny F/C); bf16 for the kernel.
    h = (x.reshape(B * N, F_in).astype(jnp.float32) @ weight.astype(jnp.float32))
    h = h.reshape(B, N, C).astype(jnp.bfloat16)

    # --- bias pre-tiled to the lane-dense output slab layout.
    bias_slab = jnp.tile(bias.astype(jnp.float32), N).reshape(1, N * C)

    BB = _pick_batch_tile(B, N, C, _vmem_budget_bytes())
    grid = (pl.cdiv(B, BB),)

    out_slab = pl.pallas_call(
        cons_graphconv_kernel,
        out_shape=jax.ShapeDtypeStruct((B, N * C), x.dtype),
        grid_spec=pltpu.PrefetchScalarGridSpec(
            num_scalar_prefetch=0,
            grid=grid,
            in_specs=[
                pl.BlockSpec((BB, N, N), lambda b: (b, 0, 0)),     # folded adj, bf16
                pl.BlockSpec((BB, N, C), lambda b: (b, 0, 0)),     # h = x @ W, bf16
                pl.BlockSpec((1, N * C), lambda b: (0, 0)),        # bias slab, resident
            ],
            out_specs=pl.BlockSpec((BB, N * C), lambda b: (b, 0)),  # lane-dense out
        ),
        compiler_params=pltpu.CompilerParams(
            dimension_semantics=("parallel",),
            vmem_limit_bytes=_vmem_limit_bytes(BB, N, C),
        ),
    )(adj_scaled, h, bias_slab)

    return out_slab.reshape(B, N, C)


# --------------------------------------------------------------------------- #
# Pure-JAX reference (mirrors the PyTorch forward, f32 end to end)
# --------------------------------------------------------------------------- #
def cons_graphconv_ref(x, adj, weight, bias, *, add_loop=True, improved=IMPROVED):
    B, N, _ = adj.shape
    eye = jnp.eye(N, dtype=adj.dtype)
    if add_loop:
        loop_val = 2.0 if improved else 1.0
        adj = jnp.where(eye[None] > 0, loop_val, adj)
    out = jnp.matmul(x, weight)
    deg_inv_sqrt = jnp.maximum(adj.sum(-1), 1.0) ** -0.5
    adj = deg_inv_sqrt[..., :, None] * adj * deg_inv_sqrt[..., None, :]
    c_adj = ALPHA * ((ALPHA + 1.0) * eye[None] + adj)
    out = jnp.matmul(c_adj, out)
    return out + bias


if __name__ == "__main__":
    key = jax.random.PRNGKey(0)
    kx, kadj, kw, kb = jax.random.split(key, 4)

    B, N = 2, 16
    in_channels, out_channels = 8, 8

    x = jax.random.normal(kx, (B, N, in_channels), dtype=jnp.float32)
    # random sparse-ish symmetric 0/1 adjacency
    a = (jax.random.uniform(kadj, (B, N, N)) > 0.7).astype(jnp.float32)
    adj = jnp.maximum(a, jnp.swapaxes(a, -1, -2))

    # Xavier-normal-style weight init (deterministic); small nonzero bias.
    std = (2.0 / (in_channels + out_channels)) ** 0.5
    weight = std * jax.random.normal(kw, (in_channels, out_channels), dtype=jnp.float32)
    bias = 0.1 * jax.random.normal(kb, (out_channels,), dtype=jnp.float32)

    out = cons_graphconv(x, adj, weight, bias)
    out = jax.block_until_ready(out)

    ref = cons_graphconv_ref(x, adj, weight, bias)
    assert out.shape == (B, N, out_channels)
    max_err = float(jnp.max(jnp.abs(out - ref)))
    # bf16 normalized adjacency and bf16 h with f32 accumulation: expected
    # max abs error ~1e-2 at these magnitudes; 3e-2 is a safe bound.
    assert max_err < 3e-2, f"max abs err {max_err}"

    print("KERNEL_OK")
</pallas_src>

<mosaic_0001>
module attributes {stable_mosaic.version = 11 : i64} {
  func.func @cons_graphconv_kernel(%arg0: i32, %arg1: memref<2x16x16xbf16, #tpu.memory_space<vmem>>, %arg2: memref<2x16x8xbf16, #tpu.memory_space<vmem>>, %arg3: memref<1x128xf32, #tpu.memory_space<vmem>>, %arg4: memref<2x128xf32, #tpu.memory_space<vmem>>) attributes {dimension_semantics = [#tpu.dimension_semantics<parallel>], iteration_bounds = array<i64: 1>, scalar_prefetch = 0 : i64, scratch_operands = 0 : i64, tpu.core_type = #tpu.core_type<tc>, window_params = [{transform_indices = @transform_0, window_bounds = array<i64: 2, 16, 16>}, {transform_indices = @transform_1, window_bounds = array<i64: 2, 16, 8>}, {pipeline_mode = #tpu.pipeline_mode<synchronous>, transform_indices = @transform_2, window_bounds = array<i64: 1, 128>}, {transform_indices = @transform_3, window_bounds = array<i64: 2, 128>}]} {
    %c0 = arith.constant 0 : index
    %c0_0 = arith.constant 0 : index
    %c0_1 = arith.constant 0 : index
    %0 = vector.load %arg1[%c0, %c0_0, %c0_1] : memref<2x16x16xbf16, #tpu.memory_space<vmem>>, vector<2x16x16xbf16>
    %c0_2 = arith.constant 0 : index
    %c0_3 = arith.constant 0 : index
    %c0_4 = arith.constant 0 : index
    %1 = vector.load %arg2[%c0_2, %c0_3, %c0_4] : memref<2x16x8xbf16, #tpu.memory_space<vmem>>, vector<2x16x8xbf16>
    "tpu.trace_start"() <{level = 10 : i32, message = "bij,bjc->bic"}> : () -> ()
    %cst = arith.constant dense<0.000000e+00> : vector<2x16x8xf32>
    %2 = tpu.matmul %0, %1, %cst {dimension_numbers = #tpu.dot_dimension_numbers<[2], [1], [1], [2], [0, 0, 0, 1, 1, 2], [0], [0]>} : vector<2x16x16xbf16>, vector<2x16x8xbf16>, vector<2x16x8xf32> -> vector<2x16x8xf32>
    "tpu.trace_stop"() : () -> ()
    %3 = arith.extf %1 : vector<2x16x8xbf16> to vector<2x16x8xf32>
    %cst_5 = arith.constant 7.500000e-01 : f32
    %4 = vector.broadcast %cst_5 : f32 to vector<2x16x8xf32>
    %5 = arith.mulf %4, %3 : vector<2x16x8xf32>
    %6 = arith.addf %5, %2 : vector<2x16x8xf32>
    %7 = vector.shape_cast %6 : vector<2x16x8xf32> to vector<2x128xf32>
    %c0_6 = arith.constant 0 : index
    %c0_7 = arith.constant 0 : index
    %8 = vector.load %arg3[%c0_6, %c0_7] : memref<1x128xf32, #tpu.memory_space<vmem>>, vector<1x128xf32>
    %9 = vector.broadcast %8 : vector<1x128xf32> to vector<2x128xf32>
    %10 = arith.addf %7, %9 : vector<2x128xf32>
    %c0_8 = arith.constant 0 : index
    %c0_9 = arith.constant 0 : index
    %11 = vector.load %arg4[%c0_8, %c0_9] : memref<2x128xf32, #tpu.memory_space<vmem>>, vector<2x128xf32>
    tpu.vector_store %arg4[%c0_8, %c0_9], %10 {strides = array<i32>} : memref<2x128xf32, #tpu.memory_space<vmem>>, vector<2x128xf32>,
    return
  }
  func.func @transform_0(%arg0: i32) -> (i32, i32, i32) {
    %c0_i32 = arith.constant 0 : i32
    %c0_i32_0 = arith.constant 0 : i32
    %c0_i32_1 = arith.constant 0 : i32
    return %arg0, %c0_i32, %c0_i32_0 : i32, i32, i32
  }
  func.func @transform_1(%arg0: i32) -> (i32, i32, i32) {
    %c0_i32 = arith.constant 0 : i32
    %c0_i32_0 = arith.constant 0 : i32
    %c0_i32_1 = arith.constant 0 : i32
    return %arg0, %c0_i32, %c0_i32_0 : i32, i32, i32
  }
  func.func @transform_2(%arg0: i32) -> (i32, i32) {
    %c0_i32 = arith.constant 0 : i32
    %c0_i32_0 = arith.constant 0 : i32
    %c0_i32_1 = arith.constant 0 : i32
    return %c0_i32, %c0_i32_0 : i32, i32
  }
  func.func @transform_3(%arg0: i32) -> (i32, i32) {
    %c0_i32 = arith.constant 0 : i32
    %c0_i32_0 = arith.constant 0 : i32
    return %arg0, %c0_i32 : i32, i32
  }
}

</mosaic_0001>

<bundles_post_ra>
// kernel: tpu_custom_call.1
= control target key start
LH: loop header
LB: loop body
LE: loop exit
PB: predicated region body
PF: predicated region fallthrough
CT: control target
= control target key end

     0   :  { %v462_v2 = vmov 0.0   ;;  %vm463_vm0 = vmmov 0   ;;  %s543_s0 = inlined_call_operand.vmem [shape: bf16[2,16,16], index: 0, kind: input, shape index: {}]   ;;  %s544_s1 = inlined_call_operand.vmem [shape: bf16[2,16,8], index: 1, kind: input, shape index: {}]   ;;  %s545_s2 = inlined_call_operand.vmem [shape: f32[1,128], index: 2, kind: input, shape index: {}]   ;;  %s546_s3 = inlined_call_operand.hbm [shape: f32[2,128], index: 3, kind: output, shape index: {}]  }
   0x1   :  { %v20_v0 = vld [vmem:[%s544_s1] sm:$0xff]   ;;  %v22_v1 = vld [vmem:[%s544_s1 + $0x8] sm:$0xff]   ;;  %402 = vmatprep.subr.bf16.mxu0 %v462_v2  ;;  %408 = vmatprep.subr.bf16.mxu1 %v462_v2 }
   0x2   :  { %v436_v3 = vld [vmem:[%s543_s0] sm:$0xff]   ;;  %404 = vmatprep.mubr.msk.bf16.mxu0 %vm463_vm0, %v462_v2  ;;  %410 = vmatprep.mubr.msk.bf16.mxu1 %vm463_vm0, %v462_v2  ;;  %v437_v4 = vld [vmem:[%s543_s0 + $0x8] sm:$0xff]  }
   0x3   :  { %8 = vsyncpa [#allocation3], 0  ;;  %403 = vmatpush3.bf16.msra.mxu0 %v20_v0  ;;  %409 = vmatpush3.bf16.msra.mxu1 %v22_v1  ;;  %vm35_vm1 = vcmask 130048   ;;  %v464_v5 = vmov 1983009808   ;;  %v151_v7 = vlaneseq  ;;  %v135_v8 = vunpack.c.l.bf16 %v20_v0  ;;  %s466_s0 = smov 16  }
   0x4   :  { %v149_v6 = vunpack.c.l.s4 %v464_v5  ;;  %v137_v9 = vunpack.c.l.bf16 %v22_v1  ;;  %v465_v12 = vmov 1934713408   ;;  %v136_v16 = vunpack.c.h.bf16 %v20_v0  ;;  %s467_s1 = smov 24   ;;  %s468_s20 = smov 8  }
   0x5   :  { %v152_v11 = vshrl.u32 %v151_v7, 7  ;;  %v180_v13 = vunpack.c.l.s4 %v465_v12  ;;  %v139_v14 = vmul.f32 0.75, %v135_v8  ;;  %v138_v20 = vunpack.c.h.bf16 %v22_v1  ;;  %s469_s21 = smov 32   ;;  %s470_s22 = smov 40  }
   0x6   :  { %405 = vmatmul.mubr.msk.bf16.vlgmr.msra.gmra.mxu0 %vm35_vm1, %v436_v3  ;;  %411 = vmatmul.mubr.msk.bf16.vlgmr.msra.gmra.mxu1 %vm35_vm1, %v437_v4  ;;  %v150_v10 = vunpack.c.0.s8 %v149_v6  ;;  %v141_v15 = vmul.f32 0.75, %v137_v9  ;;  %v140_v26 = vmul.f32 0.75, %v136_v16  ;;  %s471_s23 = smov 48   ;;  %s472_s24 = smov 56   ;;  %vm339_vm2 = vcmask 64512  }
   0x7   :  { %v181_v21 = vunpack.c.0.s8 %v180_v13  ;;  %v142_v33 = vmul.f32 0.75, %v138_v20  ;;  %s473_s25 = smov 64   ;;  %s474_s26 = smov 72   ;;  %vm342_vm3 = vcmask 195584   ;;  %vm344_vm4 = vcmask 261120  }
   0x8   :  { %v153_v17 = vsub.s32 %v150_v10, %v152_v11  ;;  %s475_s27 = smov 80   ;;  %s476_s28 = smov 88   ;;  %vm346_vm5 = vcmask 326656   ;;  %vm348_vm6 = vcmask 392192   ;;  %vm350_vm7 = vcmask 457728  }
   0x9   :  { %v184_v34 = vsub.s32 %v181_v21, %v152_v11  ;;  %s477_s29 = smov 96   ;;  %s478_s30 = smov 104   ;;  %vm352_vm8 = vcmask 523264   ;;  %vm354_vm9 = vcmask 588800   ;;  %vm356_vm10 = vcmask 654336  }
   0xa   :  { %s479_s4 = smov 112   ;;  %s480_s5 = smov 120   ;;  %vm358_vm11 = vcmask 719872   ;;  %vm360_vm12 = vcmask 785408   ;;  %vm362_vm13 = vcmask 850944   ;;  %vm364_vm14 = vcmask 916480  }
   0xb   :  { %vm366_vm15 = vcmask 982016   ;;  %s481_s8 = smov [#allocation2]  }
   0xc   :  { %s383_s9 = sshll.u32 %s481_s8, 4  ;;  %s384_s9 = int_to_ptr.vmem [resolvable:$true] %s383_s9 }
   0xd   :  { %s440_s10 = scalar_lea.vmem %s384_s9, 32  ;;  %p445_p1 = scmp.lt.s32.totalorder %s384_s9, %s384_s9 }
   0xe   :  { %p441_p0 = scmp.ne.s32.totalorder %s384_s9, %s440_s10  ;;  %p446_p2 = scmp.lt.s32.totalorder %s440_s10, %s440_s10 }
  0x10   :  { %p447_p3 = por %p446_p2, %p445_p1 }
  0x12   :  { %p448_p4 = pnand %p447_p3, %p441_p0 }
  0xc6   :  { %v73_v18 = vpop.f32.mrf.mxu0  ;;  %v128_v19 = vpop.f32.mrf.mxu1 }
  0xc7   :  { %v143_v22 = vadd.f32 %v139_v14, %v73_v18  ;;  %v145_v23 = vadd.f32 %v141_v15, %v128_v19 }
  0xc8   :  { %v406_v24 = vpop.f32.mrf.mxu0  ;;  %v412_v25 = vpop.f32.mrf.mxu1 }
  0xc9   :  { %v147_v27 = vcombine.high %v143_v22, %v462_v2  ;;  %v154_v28 = vrot.slane %v143_v22, %v153_v17  ;;  %v162_v29 = vcombine.high %v145_v23, %v462_v2  ;;  %v169_v30 = vrot.slane %v145_v23, %v153_v17 }
  0xca   :  { %v76_v31 = vpop.f32.mrf.mxu0  ;;  %v131_v32 = vpop.f32.mrf.mxu1 }
  0xcb   :  { %v161_v35 = vrot.slane %v147_v27, %v153_v17  ;;  %v176_v36 = vrot.slane %v162_v29, %v153_v17  ;;  %v177_v37 = vcombine.low %v154_v28, %v169_v30  ;;  %v178_v40 = vcombine.high %v154_v28, %v169_v30 }
  0xcc   :  { %v407_v38 = vpop.f32.mrf.mxu0  ;;  %v413_v39 = vpop.f32.mrf.mxu1  ;;  %v144_v41 = vadd.f32 %v140_v26, %v76_v31  ;;  %v146_v42 = vadd.f32 %v142_v33, %v131_v32 }
  0xcd   :  { %v192_v43 = vrot.slane %v178_v40, %v184_v34  ;;  %v522_v44 = vrot.slane %v177_v37, %v184_v34  ;;  %v193_v45 = vcombine.low %v161_v35, %v176_v36  ;;  %v194_v51 = vcombine.high %v161_v35, %v176_v36  ;;  %v397_v35 = vld [vmem:[%s545_s2] ss:$0 sm:$0xff] }
  0xce   :  { %v220_v47 = vrot.slane %v144_v41, %v153_v17  ;;  %v235_v48 = vrot.slane %v146_v42, %v153_v17  ;;  %v213_v52 = vcombine.high %v144_v41, %v462_v2  ;;  %v228_v53 = vcombine.high %v146_v42, %v462_v2 }
  0xcf   :  { %284 = vrot.lane.b32.xlu0 %v192_v43, %s466_s0  ;;  %v210_v46 = vcombine.high %v192_v43, %v462_v2  ;;  %v209_v49 = vcombine.high %v522_v44, %v462_v2  ;;  %v201_v50 = vrot.slane %v193_v45, %v184_v34  ;;  %v208_v56 = vrot.slane %v194_v51, %v184_v34 }
  0xd0   :  { %v243_v54 = vcombine.low %v220_v47, %v235_v48  ;;  %v227_v57 = vrot.slane %v213_v52, %v153_v17  ;;  %v242_v58 = vrot.slane %v228_v53, %v153_v17  ;;  %v244_v59 = vcombine.high %v220_v47, %v235_v48 }
  0xd1   :  { %288 = vrot.lane.b32.xlu1 %v210_v46, %s467_s1  ;;  %v211_v55 = vcombine.high %v201_v50, %v462_v2  ;;  %v212_v60 = vcombine.high %v208_v56, %v462_v2 }
  0xd2   :  { %v251_v61 = vrot.slane %v243_v54, %v184_v34  ;;  %v258_v63 = vrot.slane %v244_v59, %v184_v34  ;;  %v259_v0 = vcombine.low %v227_v57, %v242_v58  ;;  %v260_v4 = vcombine.high %v227_v57, %v242_v58 }
  0xd3   :  { %280 = vrot.lane.b32.xlu0 %v209_v49, %s468_s20 }
  0xd4   :  { %v275_v62 = vcombine.high %v251_v61, %v462_v2  ;;  %v276_v1 = vcombine.high %v258_v63, %v462_v2  ;;  %v267_v3 = vrot.slane %v259_v0, %v184_v34  ;;  %v274_v6 = vrot.slane %v260_v4, %v184_v34 }
  0xd5   :  { %292 = vrot.lane.b32.xlu1 %v201_v50, %s469_s21 }
  0xd6   :  { %v277_v5 = vcombine.high %v267_v3, %v462_v2  ;;  %v278_v7 = vcombine.high %v274_v6, %v462_v2 }
  0xd7   :  { %296 = vrot.lane.b32.xlu0 %v211_v55, %s470_s22 }
  0xd9   :  { %300 = vrot.lane.b32.xlu1 %v208_v56, %s471_s23 }
  0xdb   :  { %304 = vrot.lane.b32.xlu0 %v212_v60, %s472_s24 }
  0xdd   :  { %308 = vrot.lane.b32.xlu1 %v251_v61, %s473_s25 }
  0xdf   :  { %312 = vrot.lane.b32.xlu0 %v275_v62, %s474_s26 }
  0xe1   :  { %316 = vrot.lane.b32.xlu1 %v258_v63, %s475_s27 }
  0xe3   :  { %320 = vrot.lane.b32.xlu0 %v276_v1, %s476_s28 }
  0xe5   :  { %324 = vrot.lane.b32.xlu1 %v267_v3, %s477_s29 }
  0xe7   :  { %328 = vrot.lane.b32.xlu0 %v277_v5, %s478_s30 }
  0xe9   :  { %332 = vrot.lane.b32.xlu1 %v274_v6, %s479_s4 }
  0xeb   :  { %336 = vrot.lane.b32.xlu0 %v278_v7, %s480_s5 }
 0x141   :  { %v285_v8 = vpop.permute.xlu0 %284 }
 0x143   :  { %v289_v9 = vpop.permute.xlu1 %288 }
 0x145   :  { %v281_v10 = vpop.permute.xlu0 %280 }
 0x146   :  { %v340_v11 = vsel %vm339_vm2, %v522_v44, %v281_v10 }
 0x147   :  { %v341_v12 = vsel %vm35_vm1, %v340_v11, %v285_v8  ;;  %v293_v13 = vpop.permute.xlu1 %292 }
 0x148   :  { %v343_v14 = vsel %vm342_vm3, %v341_v12, %v289_v9 }
 0x149   :  { %v345_v15 = vsel %vm344_vm4, %v343_v14, %v293_v13  ;;  %v297_v16 = vpop.permute.xlu0 %296 }
 0x14a   :  { %v347_v17 = vsel %vm346_vm5, %v345_v15, %v297_v16 }
 0x14b   :  { %v301_v2 = vpop.permute.xlu1 %300 }
 0x14c   :  { %v349_v18 = vsel %vm348_vm6, %v347_v17, %v301_v2 }
 0x14d   :  { %v305_v19 = vpop.permute.xlu0 %304 }
 0x14e   :  { %v351_v20 = vsel %vm350_vm7, %v349_v18, %v305_v19 }
 0x14f   :  { %v309_v21 = vpop.permute.xlu1 %308 }
 0x150   :  { %v353_v22 = vsel %vm352_vm8, %v351_v20, %v309_v21 }
 0x151   :  { %v313_v23 = vpop.permute.xlu0 %312 }
 0x152   :  { %v355_v24 = vsel %vm354_vm9, %v353_v22, %v313_v23 }
 0x153   :  { %v317_v25 = vpop.permute.xlu1 %316 }
 0x154   :  { %v357_v26 = vsel %vm356_vm10, %v355_v24, %v317_v25 }
 0x155   :  { %v321_v27 = vpop.permute.xlu0 %320 }
 0x156   :  { %v359_v28 = vsel %vm358_vm11, %v357_v26, %v321_v27 }
 0x157   :  { %v325_v29 = vpop.permute.xlu1 %324 }
 0x158   :  { %v361_v30 = vsel %vm360_vm12, %v359_v28, %v325_v29 }
 0x159   :  { %v329_v31 = vpop.permute.xlu0 %328 }
 0x15a   :  { %v363_v32 = vsel %vm362_vm13, %v361_v30, %v329_v31 }
 0x15b   :  { %v333_v33 = vpop.permute.xlu1 %332 }
 0x15c   :  { %v365_v34 = vsel %vm364_vm14, %v363_v32, %v333_v33 }
 0x15d   :  { %v337_v36 = vpop.permute.xlu0 %336 }
 0x15e   :  { %v367_v37 = vsel %vm366_vm15, %v365_v34, %v337_v36 }
 0x15f   :  { %v375_v38 = vadd.f32 %v397_v35, %v367_v37 }
 0x161   :  { %376 = vst [vmem:[#allocation2] sm:$0x3] %v375_v38 }
 0x162   :  { %451 = shalt.err (!%p448_p4)
}
 0x163   :  { %386 = dma.vmem_to_hbm [thread:$0]  %s384_s9, 32, %s546_s3, [#allocation3]  }
 0x164   :  { %460 = dma.done.wait [#allocation3], 32  }
 0x165   :  { %461 = vsyncadd [#allocation3], 4294967264 }
 0x166   :  { %390 = vsyncpa [#allocation3], 1 }

</bundles_post_ra>
